<compile_context>
chip_gen: v5e
topology: v5e:2x2
jax: 0.10.0
libtpu: 0.0.40
codegen_flags: <defaults>
</compile_context>

<pallas_src>
import functools

import jax
import jax.numpy as jnp
from jax.experimental import pallas as pl
from jax.experimental.pallas import tpu as pltpu


_VMEM_BUDGET = 40 * 1024 * 1024   # conservative: fits v7x's 64 MiB physical VMEM


def _round_up(x, m):
    return (x + m - 1) // m * m


def _resident_kernel(x_ref, w1_ref, b1_ref, w2_ref, b2_ref, o_ref, *,
                     num_joints, dp):
    # x_ref/o_ref: (tm, J*Dp); w1/w2: (J, Dp, Dp); b1/b2: (J, 1, Dp).
    # All joints' weights are VMEM-resident; static (unrolled) joint loop with
    # 128-lane-aligned static column slices (no relayout, no masked stores).
    for j in range(num_joints):
        lo = j * dp
        xj = x_ref[:, lo:lo + dp]                              # (tm, Dp)
        h = jnp.dot(xj, w1_ref[j], preferred_element_type=jnp.float32)
        h = jnp.maximum(h + b1_ref[j], 0.0)
        oj = jnp.dot(h.astype(xj.dtype), w2_ref[j],
                     preferred_element_type=jnp.float32)
        o_ref[:, lo:lo + dp] = (oj + b2_ref[j]).astype(o_ref.dtype)


def _per_joint_kernel(x_ref, w1_ref, b1_ref, w2_ref, b2_ref, o_ref):
    # Fallback for very large weights: one joint per outer grid step.
    # x_ref/o_ref: (tm, Dp); w1/w2: (Dp, Dp); b1/b2: (1, Dp).
    x = x_ref[...]
    h = jnp.dot(x, w1_ref[...], preferred_element_type=jnp.float32)
    h = jnp.maximum(h + b1_ref[...], 0.0)
    o = jnp.dot(h.astype(x.dtype), w2_ref[...],
                preferred_element_type=jnp.float32)
    o_ref[...] = (o + b2_ref[...]).astype(o_ref.dtype)


@functools.partial(jax.jit, static_argnames=("tile_m",))
def pointwise_feed_forward(x, w1, b1, w2, b2, *, tile_m=1024):
    """x: (B, T, J, D); w1/w2: (J, D, D) stored (in, out); b1/b2: (J, D)."""
    B, T, J, D = x.shape
    M = B * T

    # Pad the feature dim to a lane multiple only if needed. Padded columns of
    # x/weights/bias are zero, so they contribute nothing and are sliced off.
    Dp = _round_up(D, 128)
    if Dp != D:
        pad = Dp - D
        x = jnp.pad(x, ((0, 0), (0, 0), (0, 0), (0, pad)))
        w1 = jnp.pad(w1, ((0, 0), (0, pad), (0, pad)))
        w2 = jnp.pad(w2, ((0, 0), (0, pad), (0, pad)))
        b1 = jnp.pad(b1, ((0, 0), (0, pad)))
        b2 = jnp.pad(b2, ((0, 0), (0, pad)))

    # Free, contiguous layout changes only (no HBM transpose passes).
    xf = x.reshape(M, J * Dp)
    b1r = b1.reshape(J, 1, Dp)
    b2r = b2.reshape(J, 1, Dp)

    x_item = jnp.dtype(x.dtype).itemsize
    w_bytes = sum(int(a.size) * jnp.dtype(a.dtype).itemsize
                  for a in (w1, w2, b1r, b2r))

    # Resident path: weights fetched once (constant index_map); the pipeline
    # still reserves two buffers for them, hence the 2x in the budget math.
    resident_w_bytes = 2 * w_bytes
    row_bytes = J * Dp * x_item                       # one row of an x tile
    use_resident = resident_w_bytes + 4 * 64 * row_bytes <= _VMEM_BUDGET

    if use_resident:
        avail = _VMEM_BUDGET - resident_w_bytes
        tm = min(tile_m, max(8, (avail // (4 * row_bytes)) // 8 * 8))
        tm = M if M <= tm else tm
        grid = (pl.cdiv(M, tm),)
        est = resident_w_bytes + 4 * tm * row_bytes
        kernel = functools.partial(_resident_kernel, num_joints=J, dp=Dp)
        in_specs = [
            pl.BlockSpec((tm, J * Dp), lambda i: (i, 0)),      # x row tile
            pl.BlockSpec((J, Dp, Dp), lambda i: (0, 0, 0)),    # all W1
            pl.BlockSpec((J, 1, Dp), lambda i: (0, 0, 0)),     # all b1
            pl.BlockSpec((J, Dp, Dp), lambda i: (0, 0, 0)),    # all W2
            pl.BlockSpec((J, 1, Dp), lambda i: (0, 0, 0)),     # all b2
        ]
        out_spec = pl.BlockSpec((tm, J * Dp), lambda i: (i, 0))
        dim_sem = ("parallel",)
    else:
        # Per-joint weight streaming; joint axis outer so W1[j]/W2[j] stay
        # resident across all inner row tiles (index_map constant along i).
        blk_w_bytes = 2 * 2 * (Dp * Dp + Dp) * jnp.dtype(w1.dtype).itemsize
        avail = _VMEM_BUDGET - blk_w_bytes
        row_b = Dp * x_item
        tm = min(tile_m, max(8, (avail // (4 * row_b)) // 8 * 8))
        tm = M if M <= tm else tm
        grid = (J, pl.cdiv(M, tm))
        est = blk_w_bytes + 4 * tm * row_b
        kernel = _per_joint_kernel
        in_specs = [
            pl.BlockSpec((tm, Dp), lambda j, i: (i, j)),           # x slab
            pl.BlockSpec((None, Dp, Dp), lambda j, i: (j, 0, 0)),  # W1[j]
            pl.BlockSpec((None, 1, Dp), lambda j, i: (j, 0, 0)),   # b1[j]
            pl.BlockSpec((None, Dp, Dp), lambda j, i: (j, 0, 0)),  # W2[j]
            pl.BlockSpec((None, 1, Dp), lambda j, i: (j, 0, 0)),   # b2[j]
        ]
        out_spec = pl.BlockSpec((tm, Dp), lambda j, i: (i, j))
        dim_sem = ("parallel", "parallel")

    # Explicit scoped-VMEM request derived from the block sizes (safe on
    # v5e/v6e's 128 MiB and v7x's 64 MiB physical VMEM).
    vmem_limit = int(min(max(est + (4 << 20), 16 << 20), 48 << 20))

    out = pl.pallas_call(
        kernel,
        out_shape=jax.ShapeDtypeStruct((M, J * Dp), x.dtype),
        grid_spec=pltpu.PrefetchScalarGridSpec(
            num_scalar_prefetch=0,
            grid=grid,
            in_specs=in_specs,
            out_specs=out_spec,
        ),
        compiler_params=pltpu.CompilerParams(
            dimension_semantics=dim_sem,
            vmem_limit_bytes=vmem_limit),
    )(xf, w1, b1r, w2, b2r)

    out = out.reshape(B, T, J, Dp)
    return out if Dp == D else out[..., :D]


def init_params(key, num_joints, d_model, dtype=jnp.float32):
    """Mirrors nn.Linear init; weights pre-transposed to (in, out) so the
    kernel computes x @ W (== x @ W_pt.T in PyTorch)."""
    ks = jax.random.split(key, 4)
    bound = 1.0 / (d_model ** 0.5)
    shape_w = (num_joints, d_model, d_model)
    shape_b = (num_joints, d_model)
    w1 = jax.random.uniform(ks[0], shape_w, dtype, -bound, bound)
    b1 = jax.random.uniform(ks[1], shape_b, dtype, -bound, bound)
    w2 = jax.random.uniform(ks[2], shape_w, dtype, -bound, bound)
    b2 = jax.random.uniform(ks[3], shape_b, dtype, -bound, bound)
    return w1, b1, w2, b2


def reference(x, w1, b1, w2, b2):
    hi = jax.lax.Precision.HIGHEST
    h = jnp.einsum("btjd,jdk->btjk", x, w1, precision=hi) + b1[None, None]
    h = jnp.maximum(h, 0.0)
    return jnp.einsum("btjd,jdk->btjk", h, w2, precision=hi) + b2[None, None]


if __name__ == "__main__":
    # Small shapes consistent with the module; D is a multiple of 128 so every
    # output store is lane-dense (unmasked vst).
    B, T, J, D = 2, 16, 4, 128

    key = jax.random.PRNGKey(0)
    kx, kp = jax.random.split(key)
    x = jax.random.normal(kx, (B, T, J, D), jnp.float32)
    w1, b1, w2, b2 = init_params(kp, J, D)

    out = pointwise_feed_forward(x, w1, b1, w2, b2)
    out = jax.block_until_ready(out)

    ref = reference(x, w1, b1, w2, b2)
    assert out.shape == (B, T, J, D)
    # NOTE: kernel uses default MXU precision with f32 accumulation; the
    # Precision.HIGHEST reference matches within 1e-3 at D=128.
    assert jnp.allclose(out, ref, atol=1e-3, rtol=1e-3), "mismatch vs reference"

    print("KERNEL_OK")
</pallas_src>

<mosaic_0001>
module attributes {stable_mosaic.version = 11 : i64} {
  func.func @_resident_kernel(%arg0: i32, %arg1: memref<32x512xf32, #tpu.memory_space<vmem>>, %arg2: memref<4x128x128xf32, #tpu.memory_space<vmem>>, %arg3: memref<4x1x128xf32, #tpu.memory_space<vmem>>, %arg4: memref<4x128x128xf32, #tpu.memory_space<vmem>>, %arg5: memref<4x1x128xf32, #tpu.memory_space<vmem>>, %arg6: memref<32x512xf32, #tpu.memory_space<vmem>>) attributes {dimension_semantics = [#tpu.dimension_semantics<parallel>], iteration_bounds = array<i64: 1>, scalar_prefetch = 0 : i64, scratch_operands = 0 : i64, tpu.core_type = #tpu.core_type<tc>, window_params = [{transform_indices = @transform_0, window_bounds = array<i64: 32, 512>}, {pipeline_mode = #tpu.pipeline_mode<synchronous>, transform_indices = @transform_1, window_bounds = array<i64: 4, 128, 128>}, {pipeline_mode = #tpu.pipeline_mode<synchronous>, transform_indices = @transform_2, window_bounds = array<i64: 4, 1, 128>}, {pipeline_mode = #tpu.pipeline_mode<synchronous>, transform_indices = @transform_3, window_bounds = array<i64: 4, 128, 128>}, {pipeline_mode = #tpu.pipeline_mode<synchronous>, transform_indices = @transform_4, window_bounds = array<i64: 4, 1, 128>}, {transform_indices = @transform_5, window_bounds = array<i64: 32, 512>}]} {
    %c0 = arith.constant 0 : index
    %c0_0 = arith.constant 0 : index
    %0 = vector.load %arg1[%c0, %c0_0] : memref<32x512xf32, #tpu.memory_space<vmem>>, vector<32x128xf32>
    %c0_1 = arith.constant 0 : index
    %c0_2 = arith.constant 0 : index
    %c0_3 = arith.constant 0 : index
    %1 = vector.load %arg2[%c0_1, %c0_2, %c0_3] : memref<4x128x128xf32, #tpu.memory_space<vmem>>, vector<1x128x128xf32>
    %2 = vector.shape_cast %1 : vector<1x128x128xf32> to vector<128x128xf32>
    %cst = arith.constant dense<0.000000e+00> : vector<32x128xf32>
    %3 = tpu.matmul %0, %2, %cst {dimension_numbers = #tpu.dot_dimension_numbers<[1], [0], [0], [1], [0, 0, 1, 1], [], []>} : vector<32x128xf32>, vector<128x128xf32>, vector<32x128xf32> -> vector<32x128xf32>
    %c0_4 = arith.constant 0 : index
    %c0_5 = arith.constant 0 : index
    %c0_6 = arith.constant 0 : index
    %4 = vector.load %arg3[%c0_4, %c0_5, %c0_6] : memref<4x1x128xf32, #tpu.memory_space<vmem>>, vector<1x1x128xf32>
    %5 = vector.shape_cast %4 : vector<1x1x128xf32> to vector<1x128xf32>
    %6 = vector.broadcast %5 : vector<1x128xf32> to vector<32x128xf32>
    %7 = arith.addf %3, %6 : vector<32x128xf32>
    %cst_7 = arith.constant 0.000000e+00 : f32
    %8 = vector.broadcast %cst_7 : f32 to vector<32x128xf32>
    %9 = arith.maximumf %7, %8 : vector<32x128xf32>
    %c0_8 = arith.constant 0 : index
    %c0_9 = arith.constant 0 : index
    %c0_10 = arith.constant 0 : index
    %10 = vector.load %arg4[%c0_8, %c0_9, %c0_10] : memref<4x128x128xf32, #tpu.memory_space<vmem>>, vector<1x128x128xf32>
    %11 = vector.shape_cast %10 : vector<1x128x128xf32> to vector<128x128xf32>
    %cst_11 = arith.constant dense<0.000000e+00> : vector<32x128xf32>
    %12 = tpu.matmul %9, %11, %cst_11 {dimension_numbers = #tpu.dot_dimension_numbers<[1], [0], [0], [1], [0, 0, 1, 1], [], []>} : vector<32x128xf32>, vector<128x128xf32>, vector<32x128xf32> -> vector<32x128xf32>
    %c0_12 = arith.constant 0 : index
    %c0_13 = arith.constant 0 : index
    %c0_14 = arith.constant 0 : index
    %13 = vector.load %arg5[%c0_12, %c0_13, %c0_14] : memref<4x1x128xf32, #tpu.memory_space<vmem>>, vector<1x1x128xf32>
    %14 = vector.shape_cast %13 : vector<1x1x128xf32> to vector<1x128xf32>
    %15 = vector.broadcast %14 : vector<1x128xf32> to vector<32x128xf32>
    %16 = arith.addf %12, %15 : vector<32x128xf32>
    %c0_15 = arith.constant 0 : index
    %c0_16 = arith.constant 0 : index
    %17 = vector.load %arg6[%c0_15, %c0_16] : memref<32x512xf32, #tpu.memory_space<vmem>>, vector<32x128xf32>
    tpu.vector_store %arg6[%c0_15, %c0_16], %16 {strides = array<i32>} : memref<32x512xf32, #tpu.memory_space<vmem>>, vector<32x128xf32>,
    %c0_17 = arith.constant 0 : index
    %c128 = arith.constant 128 : index
    %18 = vector.load %arg1[%c0_17, %c128] : memref<32x512xf32, #tpu.memory_space<vmem>>, vector<32x128xf32>
    %c1 = arith.constant 1 : index
    %c0_18 = arith.constant 0 : index
    %c0_19 = arith.constant 0 : index
    %19 = vector.load %arg2[%c1, %c0_18, %c0_19] : memref<4x128x128xf32, #tpu.memory_space<vmem>>, vector<1x128x128xf32>
    %20 = vector.shape_cast %19 : vector<1x128x128xf32> to vector<128x128xf32>
    %cst_20 = arith.constant dense<0.000000e+00> : vector<32x128xf32>
    %21 = tpu.matmul %18, %20, %cst_20 {dimension_numbers = #tpu.dot_dimension_numbers<[1], [0], [0], [1], [0, 0, 1, 1], [], []>} : vector<32x128xf32>, vector<128x128xf32>, vector<32x128xf32> -> vector<32x128xf32>
    %c1_21 = arith.constant 1 : index
    %c0_22 = arith.constant 0 : index
    %c0_23 = arith.constant 0 : index
    %22 = vector.load %arg3[%c1_21, %c0_22, %c0_23] : memref<4x1x128xf32, #tpu.memory_space<vmem>>, vector<1x1x128xf32>
    %23 = vector.shape_cast %22 : vector<1x1x128xf32> to vector<1x128xf32>
    %24 = vector.broadcast %23 : vector<1x128xf32> to vector<32x128xf32>
    %25 = arith.addf %21, %24 : vector<32x128xf32>
    %cst_24 = arith.constant 0.000000e+00 : f32
    %26 = vector.broadcast %cst_24 : f32 to vector<32x128xf32>
    %27 = arith.maximumf %25, %26 : vector<32x128xf32>
    %c1_25 = arith.constant 1 : index
    %c0_26 = arith.constant 0 : index
    %c0_27 = arith.constant 0 : index
    %28 = vector.load %arg4[%c1_25, %c0_26, %c0_27] : memref<4x128x128xf32, #tpu.memory_space<vmem>>, vector<1x128x128xf32>
    %29 = vector.shape_cast %28 : vector<1x128x128xf32> to vector<128x128xf32>
    %cst_28 = arith.constant dense<0.000000e+00> : vector<32x128xf32>
    %30 = tpu.matmul %27, %29, %cst_28 {dimension_numbers = #tpu.dot_dimension_numbers<[1], [0], [0], [1], [0, 0, 1, 1], [], []>} : vector<32x128xf32>, vector<128x128xf32>, vector<32x128xf32> -> vector<32x128xf32>
    %c1_29 = arith.constant 1 : index
    %c0_30 = arith.constant 0 : index
    %c0_31 = arith.constant 0 : index
    %31 = vector.load %arg5[%c1_29, %c0_30, %c0_31] : memref<4x1x128xf32, #tpu.memory_space<vmem>>, vector<1x1x128xf32>
    %32 = vector.shape_cast %31 : vector<1x1x128xf32> to vector<1x128xf32>
    %33 = vector.broadcast %32 : vector<1x128xf32> to vector<32x128xf32>
    %34 = arith.addf %30, %33 : vector<32x128xf32>
    %c0_32 = arith.constant 0 : index
    %c128_33 = arith.constant 128 : index
    %35 = vector.load %arg6[%c0_32, %c128_33] : memref<32x512xf32, #tpu.memory_space<vmem>>, vector<32x128xf32>
    tpu.vector_store %arg6[%c0_32, %c128_33], %34 {strides = array<i32>} : memref<32x512xf32, #tpu.memory_space<vmem>>, vector<32x128xf32>,
    %c0_34 = arith.constant 0 : index
    %c256 = arith.constant 256 : index
    %36 = vector.load %arg1[%c0_34, %c256] : memref<32x512xf32, #tpu.memory_space<vmem>>, vector<32x128xf32>
    %c2 = arith.constant 2 : index
    %c0_35 = arith.constant 0 : index
    %c0_36 = arith.constant 0 : index
    %37 = vector.load %arg2[%c2, %c0_35, %c0_36] : memref<4x128x128xf32, #tpu.memory_space<vmem>>, vector<1x128x128xf32>
    %38 = vector.shape_cast %37 : vector<1x128x128xf32> to vector<128x128xf32>
    %cst_37 = arith.constant dense<0.000000e+00> : vector<32x128xf32>
    %39 = tpu.matmul %36, %38, %cst_37 {dimension_numbers = #tpu.dot_dimension_numbers<[1], [0], [0], [1], [0, 0, 1, 1], [], []>} : vector<32x128xf32>, vector<128x128xf32>, vector<32x128xf32> -> vector<32x128xf32>
    %c2_38 = arith.constant 2 : index
    %c0_39 = arith.constant 0 : index
    %c0_40 = arith.constant 0 : index
    %40 = vector.load %arg3[%c2_38, %c0_39, %c0_40] : memref<4x1x128xf32, #tpu.memory_space<vmem>>, vector<1x1x128xf32>
    %41 = vector.shape_cast %40 : vector<1x1x128xf32> to vector<1x128xf32>
    %42 = vector.broadcast %41 : vector<1x128xf32> to vector<32x128xf32>
    %43 = arith.addf %39, %42 : vector<32x128xf32>
    %cst_41 = arith.constant 0.000000e+00 : f32
    %44 = vector.broadcast %cst_41 : f32 to vector<32x128xf32>
    %45 = arith.maximumf %43, %44 : vector<32x128xf32>
    %c2_42 = arith.constant 2 : index
    %c0_43 = arith.constant 0 : index
    %c0_44 = arith.constant 0 : index
    %46 = vector.load %arg4[%c2_42, %c0_43, %c0_44] : memref<4x128x128xf32, #tpu.memory_space<vmem>>, vector<1x128x128xf32>
    %47 = vector.shape_cast %46 : vector<1x128x128xf32> to vector<128x128xf32>
    %cst_45 = arith.constant dense<0.000000e+00> : vector<32x128xf32>
    %48 = tpu.matmul %45, %47, %cst_45 {dimension_numbers = #tpu.dot_dimension_numbers<[1], [0], [0], [1], [0, 0, 1, 1], [], []>} : vector<32x128xf32>, vector<128x128xf32>, vector<32x128xf32> -> vector<32x128xf32>
    %c2_46 = arith.constant 2 : index
    %c0_47 = arith.constant 0 : index
    %c0_48 = arith.constant 0 : index
    %49 = vector.load %arg5[%c2_46, %c0_47, %c0_48] : memref<4x1x128xf32, #tpu.memory_space<vmem>>, vector<1x1x128xf32>
    %50 = vector.shape_cast %49 : vector<1x1x128xf32> to vector<1x128xf32>
    %51 = vector.broadcast %50 : vector<1x128xf32> to vector<32x128xf32>
    %52 = arith.addf %48, %51 : vector<32x128xf32>
    %c0_49 = arith.constant 0 : index
    %c256_50 = arith.constant 256 : index
    %53 = vector.load %arg6[%c0_49, %c256_50] : memref<32x512xf32, #tpu.memory_space<vmem>>, vector<32x128xf32>
    tpu.vector_store %arg6[%c0_49, %c256_50], %52 {strides = array<i32>} : memref<32x512xf32, #tpu.memory_space<vmem>>, vector<32x128xf32>,
    %c0_51 = arith.constant 0 : index
    %c384 = arith.constant 384 : index
    %54 = vector.load %arg1[%c0_51, %c384] : memref<32x512xf32, #tpu.memory_space<vmem>>, vector<32x128xf32>
    %c3 = arith.constant 3 : index
    %c0_52 = arith.constant 0 : index
    %c0_53 = arith.constant 0 : index
    %55 = vector.load %arg2[%c3, %c0_52, %c0_53] : memref<4x128x128xf32, #tpu.memory_space<vmem>>, vector<1x128x128xf32>
    %56 = vector.shape_cast %55 : vector<1x128x128xf32> to vector<128x128xf32>
    %cst_54 = arith.constant dense<0.000000e+00> : vector<32x128xf32>
    %57 = tpu.matmul %54, %56, %cst_54 {dimension_numbers = #tpu.dot_dimension_numbers<[1], [0], [0], [1], [0, 0, 1, 1], [], []>} : vector<32x128xf32>, vector<128x128xf32>, vector<32x128xf32> -> vector<32x128xf32>
    %c3_55 = arith.constant 3 : index
    %c0_56 = arith.constant 0 : index
    %c0_57 = arith.constant 0 : index
    %58 = vector.load %arg3[%c3_55, %c0_56, %c0_57] : memref<4x1x128xf32, #tpu.memory_space<vmem>>, vector<1x1x128xf32>
    %59 = vector.shape_cast %58 : vector<1x1x128xf32> to vector<1x128xf32>
    %60 = vector.broadcast %59 : vector<1x128xf32> to vector<32x128xf32>
    %61 = arith.addf %57, %60 : vector<32x128xf32>
    %cst_58 = arith.constant 0.000000e+00 : f32
    %62 = vector.broadcast %cst_58 : f32 to vector<32x128xf32>
    %63 = arith.maximumf %61, %62 : vector<32x128xf32>
    %c3_59 = arith.constant 3 : index
    %c0_60 = arith.constant 0 : index
    %c0_61 = arith.constant 0 : index
    %64 = vector.load %arg4[%c3_59, %c0_60, %c0_61] : memref<4x128x128xf32, #tpu.memory_space<vmem>>, vector<1x128x128xf32>
    %65 = vector.shape_cast %64 : vector<1x128x128xf32> to vector<128x128xf32>
    %cst_62 = arith.constant dense<0.000000e+00> : vector<32x128xf32>
    %66 = tpu.matmul %63, %65, %cst_62 {dimension_numbers = #tpu.dot_dimension_numbers<[1], [0], [0], [1], [0, 0, 1, 1], [], []>} : vector<32x128xf32>, vector<128x128xf32>, vector<32x128xf32> -> vector<32x128xf32>
    %c3_63 = arith.constant 3 : index
    %c0_64 = arith.constant 0 : index
    %c0_65 = arith.constant 0 : index
    %67 = vector.load %arg5[%c3_63, %c0_64, %c0_65] : memref<4x1x128xf32, #tpu.memory_space<vmem>>, vector<1x1x128xf32>
    %68 = vector.shape_cast %67 : vector<1x1x128xf32> to vector<1x128xf32>
    %69 = vector.broadcast %68 : vector<1x128xf32> to vector<32x128xf32>
    %70 = arith.addf %66, %69 : vector<32x128xf32>
    %c0_66 = arith.constant 0 : index
    %c384_67 = arith.constant 384 : index
    %71 = vector.load %arg6[%c0_66, %c384_67] : memref<32x512xf32, #tpu.memory_space<vmem>>, vector<32x128xf32>
    tpu.vector_store %arg6[%c0_66, %c384_67], %70 {strides = array<i32>} : memref<32x512xf32, #tpu.memory_space<vmem>>, vector<32x128xf32>,
    return
  }
  func.func @transform_0(%arg0: i32) -> (i32, i32) {
    %c0_i32 = arith.constant 0 : i32
    %c0_i32_0 = arith.constant 0 : i32
    return %arg0, %c0_i32 : i32, i32
  }
  func.func @transform_1(%arg0: i32) -> (i32, i32, i32) {
    %c0_i32 = arith.constant 0 : i32
    %c0_i32_0 = arith.constant 0 : i32
    %c0_i32_1 = arith.constant 0 : i32
    %c0_i32_2 = arith.constant 0 : i32
    return %c0_i32, %c0_i32_0, %c0_i32_1 : i32, i32, i32
  }
  func.func @transform_2(%arg0: i32) -> (i32, i32, i32) {
    %c0_i32 = arith.constant 0 : i32
    %c0_i32_0 = arith.constant 0 : i32
    %c0_i32_1 = arith.constant 0 : i32
    %c0_i32_2 = arith.constant 0 : i32
    return %c0_i32, %c0_i32_0, %c0_i32_1 : i32, i32, i32
  }
  func.func @transform_3(%arg0: i32) -> (i32, i32, i32) {
    %c0_i32 = arith.constant 0 : i32
    %c0_i32_0 = arith.constant 0 : i32
    %c0_i32_1 = arith.constant 0 : i32
    %c0_i32_2 = arith.constant 0 : i32
    return %c0_i32, %c0_i32_0, %c0_i32_1 : i32, i32, i32
  }
  func.func @transform_4(%arg0: i32) -> (i32, i32, i32) {
    %c0_i32 = arith.constant 0 : i32
    %c0_i32_0 = arith.constant 0 : i32
    %c0_i32_1 = arith.constant 0 : i32
    %c0_i32_2 = arith.constant 0 : i32
    return %c0_i32, %c0_i32_0, %c0_i32_1 : i32, i32, i32
  }
  func.func @transform_5(%arg0: i32) -> (i32, i32) {
    %c0_i32 = arith.constant 0 : i32
    %c0_i32_0 = arith.constant 0 : i32
    return %arg0, %c0_i32 : i32, i32
  }
}

</mosaic_0001>

<bundles_post_ra>
// kernel: pointwise_feed_forward.1
= control target key start
LH: loop header
LB: loop body
LE: loop exit
PB: predicated region body
PF: predicated region fallthrough
CT: control target
= control target key end

     0   :  { %10 = vsyncpa [#allocation3], 0  ;;  %s740_s0 = inlined_call_operand.vmem [shape: f32[32,512], index: 0, kind: input, shape index: {}]   ;;  %s741_s1 = inlined_call_operand.hbm [shape: f32[4,128,128], index: 1, kind: input, shape index: {}]   ;;  %s742_s2 = inlined_call_operand.vmem [shape: f32[4,1,128], index: 2, kind: input, shape index: {}]   ;;  %s743_s3 = inlined_call_operand.hbm [shape: f32[4,128,128], index: 3, kind: input, shape index: {}]   ;;  %s744_s4 = inlined_call_operand.vmem [shape: f32[4,1,128], index: 4, kind: input, shape index: {}]   ;;  %s745_s5 = inlined_call_operand.vmem [shape: f32[32,512], index: 5, kind: output, shape index: {}]  }
   0x1   :  { %s18_s20 = sshll.u32 %s741_s1, 4  ;;  %s19_s20 = int_to_ptr.hbm [resolvable:$true] %s18_s20 }
   0x2   :  { %11 = vsyncpa [#allocation5], 0  ;;  %s580_s21 = smov [#allocation2]   ;;  %s33_s25 = sshll.u32 %s743_s3, 4  ;;  %s34_s25 = int_to_ptr.hbm [resolvable:$true] %s33_s25 }
   0x3   :  { %s20_s22 = sshll.u32 %s580_s21, 4  ;;  %s581_s26 = smov 128   ;;  %s21_s22 = int_to_ptr.vmem [resolvable:$true] %s20_s22 }
   0x4   :  { %s582_s27 = smov 8   ;;  %s583_s28 = smov [#allocation4]  }
   0x5   :  { %26 = dma.hbm_to_vmem [thread:$0]  %s19_s20, 8192, %s21_s22, [#allocation3], %s581_s26, %s581_s26, %s582_s27  }
   0x6   :  { %s35_s29 = sshll.u32 %s583_s28, 4  ;;  %s36_s29 = int_to_ptr.vmem [resolvable:$true] %s35_s29 }
   0x7   :  { %41 = dma.hbm_to_vmem [thread:$0]  %s34_s25, 8192, %s36_s29, [#allocation5], %s581_s26, %s581_s26, %s582_s27  }
   0x8   :  { %576 = dma.done.wait [#allocation3], 8192  }
   0x9   :  { %577 = vsyncadd [#allocation3], 4294959104 }
   0xa   :  { %578 = dma.done.wait [#allocation5], 8192  }
   0xb   :  { %579 = vsyncadd [#allocation5], 4294959104  ;;  %v182_v0 = vld [vmem:[#allocation2 + $0xf8] sm:$0xff]  ;;  %v181_v1 = vld [vmem:[#allocation2 + $0xf0] sm:$0xff] }
   0xc   :  { %188 = vmatpush.msra.mxu2 %v182_v0  ;;  %v180_v2 = vld [vmem:[#allocation2 + $0xe8] sm:$0xff]  ;;  %v71_v3 = vld [vmem:[#allocation2 + $0x78] sm:$0xff]  ;;  %v70_v4 = vld [vmem:[#allocation2 + $0x70] sm:$0xff] }
   0xd   :  { %76 = vmatpush.msra.mxu0 %v71_v3  ;;  %v179_v5 = vld [vmem:[#allocation2 + $0xe0] sm:$0xff]  ;;  %v69_v6 = vld [vmem:[#allocation2 + $0x68] sm:$0xff]  ;;  %v178_v7 = vld [vmem:[#allocation2 + $0xd8] sm:$0xff] }
   0xe   :  { %189 = vmatpush.msra.mxu2 %v181_v1  ;;  %v68_v8 = vld [vmem:[#allocation2 + $0x60] sm:$0xff]  ;;  %v177_v9 = vld [vmem:[#allocation2 + $0xd0] sm:$0xff]  ;;  %v67_v10 = vld [vmem:[#allocation2 + $0x58] sm:$0xff] }
   0xf   :  { %77 = vmatpush.msra.mxu0 %v70_v4  ;;  %v176_v11 = vld [vmem:[#allocation2 + $0xc8] sm:$0xff]  ;;  %v66_v12 = vld [vmem:[#allocation2 + $0x50] sm:$0xff]  ;;  %v175_v13 = vld [vmem:[#allocation2 + $0xc0] sm:$0xff] }
  0x10   :  { %190 = vmatpush.msra.mxu2 %v180_v2  ;;  %v65_v14 = vld [vmem:[#allocation2 + $0x48] sm:$0xff]  ;;  %v174_v15 = vld [vmem:[#allocation2 + $0xb8] sm:$0xff]  ;;  %v64_v16 = vld [vmem:[#allocation2 + $0x40] sm:$0xff] }
  0x11   :  { %78 = vmatpush.msra.mxu0 %v69_v6  ;;  %v173_v17 = vld [vmem:[#allocation2 + $0xb0] sm:$0xff]  ;;  %v63_v18 = vld [vmem:[#allocation2 + $0x38] sm:$0xff]  ;;  %v172_v19 = vld [vmem:[#allocation2 + $0xa8] sm:$0xff] }
  0x12   :  { %191 = vmatpush.msra.mxu2 %v179_v5  ;;  %v62_v20 = vld [vmem:[#allocation2 + $0x30] sm:$0xff]  ;;  %v171_v21 = vld [vmem:[#allocation2 + $0xa0] sm:$0xff]  ;;  %v61_v22 = vld [vmem:[#allocation2 + $0x28] sm:$0xff] }
  0x13   :  { %79 = vmatpush.msra.mxu0 %v68_v8  ;;  %v170_v23 = vld [vmem:[#allocation2 + $0x98] sm:$0xff]  ;;  %v60_v24 = vld [vmem:[#allocation2 + $0x20] sm:$0xff]  ;;  %v169_v25 = vld [vmem:[#allocation2 + $0x90] sm:$0xff] }
  0x14   :  { %192 = vmatpush.msra.mxu2 %v178_v7  ;;  %v59_v26 = vld [vmem:[#allocation2 + $0x18] sm:$0xff]  ;;  %v168_v27 = vld [vmem:[#allocation2 + $0x88] sm:$0xff]  ;;  %v58_v28 = vld [vmem:[#allocation2 + $0x10] sm:$0xff] }
  0x15   :  { %80 = vmatpush.msra.mxu0 %v67_v10  ;;  %v167_v29 = vld [vmem:[#allocation2 + $0x80] sm:$0xff]  ;;  %v57_v30 = vld [vmem:[#allocation2 + $0x8] sm:$0xff]  ;;  %v410_v32 = vld [vmem:[#allocation2 + $0x1f8] sm:$0xff] }
  0x16   :  { %193 = vmatpush.msra.mxu2 %v177_v9  ;;  %v162_v31 = vld [vmem:[%s740_s0 + $0x8] sm:$0xff]  ;;  %v56_v33 = vld [vmem:[#allocation2] sm:$0xff]  ;;  %v409_v35 = vld [vmem:[#allocation2 + $0x1f0] sm:$0xff] }
  0x17   :  { %81 = vmatpush.msra.mxu0 %v66_v12  ;;  %v52_v34 = vld [vmem:[%s740_s0] sm:$0xff]  ;;  %v296_v36 = vld [vmem:[#allocation2 + $0x178] sm:$0xff]  ;;  %v408_v37 = vld [vmem:[#allocation2 + $0x1e8] sm:$0xff] }
  0x18   :  { %194 = vmatpush.msra.mxu2 %v176_v11  ;;  %v295_v38 = vld [vmem:[#allocation2 + $0x170] sm:$0xff]  ;;  %v407_v39 = vld [vmem:[#allocation2 + $0x1e0] sm:$0xff]  ;;  %v294_v40 = vld [vmem:[#allocation2 + $0x168] sm:$0xff] }
  0x19   :  { %82 = vmatpush.msra.mxu0 %v65_v14  ;;  %v163_v41 = vld [vmem:[%s740_s0 + $0x28] sm:$0xff]  ;;  %v406_v42 = vld [vmem:[#allocation2 + $0x1d8] sm:$0xff]  ;;  %v293_v43 = vld [vmem:[#allocation2 + $0x160] sm:$0xff] }
  0x1a   :  { %195 = vmatpush.msra.mxu2 %v175_v13  ;;  %v53_v44 = vld [vmem:[%s740_s0 + $0x20] sm:$0xff]  ;;  %v405_v45 = vld [vmem:[#allocation2 + $0x1d0] sm:$0xff]  ;;  %v292_v46 = vld [vmem:[#allocation2 + $0x158] sm:$0xff] }
  0x1b   :  { %83 = vmatpush.msra.mxu0 %v64_v16  ;;  %v404_v47 = vld [vmem:[#allocation2 + $0x1c8] sm:$0xff]  ;;  %v291_v48 = vld [vmem:[#allocation2 + $0x150] sm:$0xff]  ;;  %v403_v49 = vld [vmem:[#allocation2 + $0x1c0] sm:$0xff] }
  0x1c   :  { %196 = vmatpush.msra.mxu2 %v174_v15  ;;  %v290_v50 = vld [vmem:[#allocation2 + $0x148] sm:$0xff]  ;;  %v402_v52 = vld [vmem:[#allocation2 + $0x1b8] sm:$0xff]  ;;  %v289_v53 = vld [vmem:[#allocation2 + $0x140] sm:$0xff] }
  0x1d   :  { %84 = vmatpush.msra.mxu0 %v63_v18  ;;  %v164_v51 = vld [vmem:[%s740_s0 + $0x48] sm:$0xff]  ;;  %v54_v54 = vld [vmem:[%s740_s0 + $0x40] sm:$0xff]  ;;  %v401_v55 = vld [vmem:[#allocation2 + $0x1b0] sm:$0xff] }
  0x1e   :  { %197 = vmatpush.msra.mxu2 %v173_v17  ;;  %v288_v56 = vld [vmem:[#allocation2 + $0x138] sm:$0xff]  ;;  %v400_v57 = vld [vmem:[#allocation2 + $0x1a8] sm:$0xff]  ;;  %v287_v58 = vld [vmem:[#allocation2 + $0x130] sm:$0xff] }
  0x1f   :  { %85 = vmatpush.msra.mxu0 %v62_v20  ;;  %v399_v59 = vld [vmem:[#allocation2 + $0x1a0] sm:$0xff]  ;;  %v286_v60 = vld [vmem:[#allocation2 + $0x128] sm:$0xff]  ;;  %v398_v62 = vld [vmem:[#allocation2 + $0x198] sm:$0xff] }
  0x20   :  { %198 = vmatpush.msra.mxu2 %v172_v19  ;;  %v165_v61 = vld [vmem:[%s740_s0 + $0x68] sm:$0xff]  ;;  %v285_v63 = vld [vmem:[#allocation2 + $0x120] sm:$0xff]  ;;  %v397_v1 = vld [vmem:[#allocation2 + $0x190] sm:$0xff] }
  0x21   :  { %86 = vmatpush.msra.mxu0 %v61_v22  ;;  %v55_v0 = vld [vmem:[%s740_s0 + $0x60] sm:$0xff]  ;;  %v284_v2 = vld [vmem:[#allocation2 + $0x118] sm:$0xff]  ;;  %v396_v3 = vld [vmem:[#allocation2 + $0x188] sm:$0xff] }
  0x22   :  { %199 = vmatpush.msra.mxu2 %v171_v21  ;;  %v283_v4 = vld [vmem:[#allocation2 + $0x110] sm:$0xff]  ;;  %v237_v5 = vld [vmem:[#allocation4 + $0xf8] sm:$0xff]  ;;  %v395_v9 = vld [vmem:[#allocation2 + $0x180] sm:$0xff] }
  0x23   :  { %87 = vmatpush.msra.mxu0 %v60_v24  ;;  %v236_v6 = vld [vmem:[#allocation4 + $0xf0] sm:$0xff]  ;;  %v124_v7 = vld [vmem:[#allocation4 + $0x78] sm:$0xff]  ;;  %v282_v10 = vld [vmem:[#allocation2 + $0x108] sm:$0xff]  ;;  %243 = vmatpush.msra.mxu3 %v237_v5 }
  0x24   :  { %200 = vmatpush.msra.mxu2 %v170_v23  ;;  %v123_v8 = vld [vmem:[#allocation4 + $0x70] sm:$0xff]  ;;  %129 = vmatpush.msra.mxu1 %v124_v7  ;;  %v390_v11 = vld [vmem:[%s740_s0 + $0x18] sm:$0xff]  ;;  %v235_v12 = vld [vmem:[#allocation4 + $0xe8] sm:$0xff] }
  0x25   :  { %88 = vmatpush.msra.mxu0 %v59_v26  ;;  %v281_v13 = vld [vmem:[#allocation2 + $0x100] sm:$0xff]  ;;  %244 = vmatpush.msra.mxu3 %v236_v6  ;;  %v122_v14 = vld [vmem:[#allocation4 + $0x68] sm:$0xff]  ;;  %v276_v15 = vld [vmem:[%s740_s0 + $0x10] sm:$0xff] }
  0x26   :  { %201 = vmatpush.msra.mxu2 %v169_v25  ;;  %130 = vmatpush.msra.mxu1 %v123_v8  ;;  %v234_v16 = vld [vmem:[#allocation4 + $0xe0] sm:$0xff]  ;;  %v233_v18 = vld [vmem:[#allocation4 + $0xd8] sm:$0xff]  ;;  %v232_v20 = vld [vmem:[#allocation4 + $0xd0] sm:$0xff] }
  0x27   :  { %89 = vmatpush.msra.mxu0 %v58_v28  ;;  %245 = vmatpush.msra.mxu3 %v235_v12  ;;  %v121_v17 = vld [vmem:[#allocation4 + $0x60] sm:$0xff]  ;;  %v120_v19 = vld [vmem:[#allocation4 + $0x58] sm:$0xff]  ;;  %v119_v21 = vld [vmem:[#allocation4 + $0x50] sm:$0xff] }
  0x28   :  { %202 = vmatpush.msra.mxu2 %v168_v27  ;;  %131 = vmatpush.msra.mxu1 %v122_v14  ;;  %v391_v22 = vld [vmem:[%s740_s0 + $0x38] sm:$0xff]  ;;  %v231_v23 = vld [vmem:[#allocation4 + $0xc8] sm:$0xff]  ;;  %v277_v25 = vld [vmem:[%s740_s0 + $0x30] sm:$0xff] }
  0x29   :  { %90 = vmatpush.msra.mxu0 %v57_v30  ;;  %246 = vmatpush.msra.mxu3 %v234_v16  ;;  %v118_v24 = vld [vmem:[#allocation4 + $0x48] sm:$0xff]  ;;  %v230_v26 = vld [vmem:[#allocation4 + $0xc0] sm:$0xff]  ;;  %v229_v28 = vld [vmem:[#allocation4 + $0xb8] sm:$0xff] }
  0x2a   :  { %203 = vmatpush.msra.mxu2 %v167_v29  ;;  %132 = vmatpush.msra.mxu1 %v121_v17  ;;  %v117_v27 = vld [vmem:[#allocation4 + $0x40] sm:$0xff]  ;;  %v116_v29 = vld [vmem:[#allocation4 + $0x38] sm:$0xff]  ;;  %v228_v30 = vld [vmem:[#allocation4 + $0xb0] sm:$0xff] }
  0x2b   :  { %204 = vmatmul.f32.vlgmr.msra.gmra.mxu2 %v162_v31  ;;  %91 = vmatpush.msra.mxu0 %v56_v33  ;;  %v115_v31 = vld [vmem:[#allocation4 + $0x30] sm:$0xff]  ;;  %v227_v33 = vld [vmem:[#allocation4 + $0xa8] sm:$0xff]  ;;  %v454_v5 = vld [vmem:[#allocation4 + $0x1a0] sm:$0xff] }
  0x2c   :  { %416 = vmatpush.msrb.mxu2 %v410_v32  ;;  %92 = vmatmul.f32.vlgmr.msra.gmra.mxu0 %v52_v34  ;;  %v392_v32 = vld [vmem:[%s740_s0 + $0x58] sm:$0xff]  ;;  %v114_v34 = vld [vmem:[#allocation4 + $0x28] sm:$0xff]  ;;  %v520_v6 = vld [vmem:[%s742_s2 + $0x1] ss:$0 sm:$0xff] }
  0x2d   :  { %302 = vmatpush.msrb.mxu0 %v296_v36  ;;  %247 = vmatpush.msra.mxu3 %v233_v18  ;;  %v226_v36 = vld [vmem:[#allocation4 + $0xa0] sm:$0xff]  ;;  %v452_v12 = vld [vmem:[#allocation4 + $0x190] sm:$0xff]  ;;  %v451_v17 = vld [vmem:[#allocation4 + $0x188] sm:$0xff] }
  0x2e   :  { %417 = vmatpush.msrb.mxu2 %v409_v35  ;;  %133 = vmatpush.msra.mxu1 %v120_v19  ;;  %v278_v35 = vld [vmem:[%s740_s0 + $0x50] sm:$0xff]  ;;  %v340_v16 = vld [vmem:[#allocation4 + $0x120] sm:$0xff]  ;;  %v339_v19 = vld [vmem:[#allocation4 + $0x118] sm:$0xff] }
  0x2f   :  { %303 = vmatpush.msrb.mxu0 %v295_v38  ;;  %248 = vmatpush.msra.mxu3 %v232_v20  ;;  %v393_v38 = vld [vmem:[%s740_s0 + $0x78] sm:$0xff]  ;;  %v450_v20 = vld [vmem:[#allocation4 + $0x180] sm:$0xff] }
  0x30   :  { %418 = vmatpush.msrb.mxu2 %v408_v37  ;;  %134 = vmatpush.msra.mxu1 %v119_v21  ;;  %v225_v37 = vld [vmem:[#allocation4 + $0x98] sm:$0xff]  ;;  %v338_v21 = vld [vmem:[#allocation4 + $0x110] sm:$0xff] }
  0x31   :  { %304 = vmatpush.msrb.mxu0 %v294_v40  ;;  %249 = vmatpush.msra.mxu3 %v231_v23  ;;  %v224_v40 = vld [vmem:[#allocation4 + $0x90] sm:$0xff] }
  0x32   :  { %419 = vmatpush.msrb.mxu2 %v407_v39  ;;  %135 = vmatpush.msra.mxu1 %v118_v24  ;;  %v279_v39 = vld [vmem:[%s740_s0 + $0x70] sm:$0xff]  ;;  %v337_v24 = vld [vmem:[#allocation4 + $0x108] sm:$0xff] }
  0x33   :  { %207 = vmatmul.f32.gmra.mxu2 %v163_v41  ;;  %305 = vmatpush.msrb.mxu0 %v293_v43  ;;  %v113_v41 = vld [vmem:[#allocation4 + $0x20] sm:$0xff]  ;;  %v112_v43 = vld [vmem:[#allocation4 + $0x18] sm:$0xff] }
  0x34   :  { %420 = vmatpush.msrb.mxu2 %v406_v42  ;;  %95 = vmatmul.f32.gmra.mxu0 %v53_v44  ;;  %v223_v42 = vld [vmem:[#allocation4 + $0x88] sm:$0xff]  ;;  %v222_v44 = vld [vmem:[#allocation4 + $0x80] sm:$0xff] }
  0x35   :  { %306 = vmatpush.msrb.mxu0 %v292_v46  ;;  %250 = vmatpush.msra.mxu3 %v230_v26  ;;  %v111_v46 = vld [vmem:[#allocation4 + $0x10] sm:$0xff] }
  0x36   :  { %421 = vmatpush.msrb.mxu2 %v405_v45  ;;  %136 = vmatpush.msra.mxu1 %v117_v27  ;;  %v465_v45 = vld [vmem:[#allocation4 + $0x1f8] sm:$0xff] }
  0x37   :  { %307 = vmatpush.msrb.mxu0 %v291_v48  ;;  %251 = vmatpush.msra.mxu3 %v229_v28  ;;  %v110_v48 = vld [vmem:[#allocation4 + $0x8] sm:$0xff]  ;;  %v336_v28 = vld [vmem:[#allocation4 + $0x100] sm:$0xff] }
  0x38   :  { %422 = vmatpush.msrb.mxu2 %v404_v47  ;;  %137 = vmatpush.msra.mxu1 %v116_v29  ;;  %v464_v47 = vld [vmem:[#allocation4 + $0x1f0] sm:$0xff] }
  0x39   :  { %308 = vmatpush.msrb.mxu0 %v290_v50  ;;  %252 = vmatpush.msra.mxu3 %v228_v30  ;;  %v109_v50 = vld [vmem:[#allocation4] sm:$0xff] }
  0x3a   :  { %423 = vmatpush.msrb.mxu2 %v403_v49  ;;  %138 = vmatpush.msra.mxu1 %v115_v31  ;;  %v463_v49 = vld [vmem:[#allocation4 + $0x1e8] sm:$0xff] }
  0x3b   :  { %210 = vmatmul.f32.gmra.mxu2 %v164_v51  ;;  %309 = vmatpush.msrb.mxu0 %v289_v53  ;;  %v351_v51 = vld [vmem:[#allocation4 + $0x178] sm:$0xff]  ;;  %v350_v53 = vld [vmem:[#allocation4 + $0x170] sm:$0xff] }
  0x3c   :  { %424 = vmatpush.msrb.mxu2 %v402_v52  ;;  %98 = vmatmul.f32.gmra.mxu0 %v54_v54  ;;  %v462_v52 = vld [vmem:[#allocation4 + $0x1e0] sm:$0xff]  ;;  %v461_v54 = vld [vmem:[#allocation4 + $0x1d8] sm:$0xff] }
  0x3d   :  { %310 = vmatpush.msrb.mxu0 %v288_v56  ;;  %253 = vmatpush.msra.mxu3 %v227_v33  ;;  %v460_v56 = vld [vmem:[#allocation4 + $0x1d0] sm:$0xff] }
  0x3e   :  { %425 = vmatpush.msrb.mxu2 %v401_v55  ;;  %139 = vmatpush.msra.mxu1 %v114_v34  ;;  %v349_v55 = vld [vmem:[#allocation4 + $0x168] sm:$0xff] }
  0x3f   :  { %311 = vmatpush.msrb.mxu0 %v287_v58  ;;  %254 = vmatpush.msra.mxu3 %v226_v36  ;;  %v459_v58 = vld [vmem:[#allocation4 + $0x1c8] sm:$0xff] }
  0x40   :  { %426 = vmatpush.msrb.mxu2 %v400_v57  ;;  %140 = vmatpush.msra.mxu1 %v113_v41  ;;  %v348_v57 = vld [vmem:[#allocation4 + $0x160] sm:$0xff] }
  0x41   :  { %312 = vmatpush.msrb.mxu0 %v286_v60  ;;  %255 = vmatpush.msra.mxu3 %v225_v37  ;;  %v458_v60 = vld [vmem:[#allocation4 + $0x1c0] sm:$0xff] }
  0x42   :  { %427 = vmatpush.msrb.mxu2 %v399_v59  ;;  %141 = vmatpush.msra.mxu1 %v112_v43  ;;  %v347_v59 = vld [vmem:[#allocation4 + $0x158] sm:$0xff]  ;;  %v523_v41 = vld [vmem:[%s742_s2 + $0x2] ss:$0 sm:$0xff] }
  0x43   :  { %213 = vmatmul.f32.gmra.mxu2 %v165_v61  ;;  %313 = vmatpush.msrb.mxu0 %v285_v63  ;;  %v346_v61 = vld [vmem:[#allocation4 + $0x150] sm:$0xff]  ;;  %v345_v63 = vld [vmem:[#allocation4 + $0x148] sm:$0xff] }
  0x44   :  { %428 = vmatpush.msrb.mxu2 %v398_v62  ;;  %101 = vmatmul.f32.gmra.mxu0 %v55_v0  ;;  %v457_v62 = vld [vmem:[#allocation4 + $0x1b8] sm:$0xff]  ;;  %v456_v0 = vld [vmem:[#allocation4 + $0x1b0] sm:$0xff] }
  0x45   :  { %314 = vmatpush.msrb.mxu0 %v284_v2  ;;  %256 = vmatpush.msra.mxu3 %v224_v40  ;;  %v344_v2 = vld [vmem:[#allocation4 + $0x140] sm:$0xff] }
  0x46   :  { %429 = vmatpush.msrb.mxu2 %v397_v1  ;;  %142 = vmatpush.msra.mxu1 %v111_v46  ;;  %v521_v1 = vld [vmem:[%s742_s2] ss:$0 sm:$0xff] }
  0x47   :  { %315 = vmatpush.msrb.mxu0 %v283_v4  ;;  %257 = vmatpush.msra.mxu3 %v223_v42  ;;  %v343_v4 = vld [vmem:[#allocation4 + $0x138] sm:$0xff] }
  0x48   :  { %430 = vmatpush.msrb.mxu2 %v396_v3  ;;  %143 = vmatpush.msra.mxu1 %v110_v48  ;;  %v455_v3 = vld [vmem:[#allocation4 + $0x1a8] sm:$0xff] }
  0x49   :  { %316 = vmatpush.msrb.mxu0 %v282_v10  ;;  %258 = vmatpush.msra.mxu3 %v222_v44  ;;  %v453_v10 = vld [vmem:[#allocation4 + $0x198] sm:$0xff]  ;;  %v522_v44 = vld [vmem:[%s742_s2 + $0x3] ss:$0 sm:$0xff] }
  0x4a   :  { %431 = vmatpush.msrb.mxu2 %v395_v9  ;;  %144 = vmatpush.msra.mxu1 %v109_v50  ;;  %v342_v9 = vld [vmem:[#allocation4 + $0x130] sm:$0xff] }
  0x4b   :  { %432 = vmatmul.f32.vlgmr.msrb.gmra.mxu2 %v390_v11  ;;  %317 = vmatpush.msrb.mxu0 %v281_v13  ;;  %v341_v11 = vld [vmem:[#allocation4 + $0x128] sm:$0xff] }
  0x4c   :  { %318 = vmatmul.f32.vlgmr.msrb.gmra.mxu0 %v276_v15  ;;  %471 = vmatpush.msrb.mxu3 %v465_v45 }
  0x4d   :  { %357 = vmatpush.msrb.mxu1 %v351_v51 }
  0x4e   :  { %472 = vmatpush.msrb.mxu3 %v464_v47 }
  0x4f   :  { %358 = vmatpush.msrb.mxu1 %v350_v53 }
  0x50   :  { %473 = vmatpush.msrb.mxu3 %v463_v49 }
  0x51   :  { %359 = vmatpush.msrb.mxu1 %v349_v55 }
  0x52   :  { %474 = vmatpush.msrb.mxu3 %v462_v52 }
  0x53   :  { %435 = vmatmul.f32.gmra.mxu2 %v391_v22  ;;  %360 = vmatpush.msrb.mxu1 %v348_v57 }
  0x54   :  { %321 = vmatmul.f32.gmra.mxu0 %v277_v25  ;;  %475 = vmatpush.msrb.mxu3 %v461_v54 }
  0x55   :  { %361 = vmatpush.msrb.mxu1 %v347_v59 }
  0x56   :  { %476 = vmatpush.msrb.mxu3 %v460_v56 }
  0x57   :  { %362 = vmatpush.msrb.mxu1 %v346_v61 }
  0x58   :  { %477 = vmatpush.msrb.mxu3 %v459_v58 }
  0x59   :  { %363 = vmatpush.msrb.mxu1 %v345_v63 }
  0x5a   :  { %478 = vmatpush.msrb.mxu3 %v458_v60 }
  0x5b   :  { %438 = vmatmul.f32.gmra.mxu2 %v392_v32  ;;  %364 = vmatpush.msrb.mxu1 %v344_v2 }
  0x5c   :  { %324 = vmatmul.f32.gmra.mxu0 %v278_v35  ;;  %479 = vmatpush.msrb.mxu3 %v457_v62 }
  0x5d   :  { %365 = vmatpush.msrb.mxu1 %v343_v4  ;;  %v524_v4 = vld [vmem:[%s744_s4] ss:$0 sm:$0xff] }
  0x5e   :  { %480 = vmatpush.msrb.mxu3 %v456_v0 }
  0x5f   :  { %366 = vmatpush.msrb.mxu1 %v342_v9 }
  0x60   :  { %481 = vmatpush.msrb.mxu3 %v455_v3 }
  0x61   :  { %367 = vmatpush.msrb.mxu1 %v341_v11 }
  0x62   :  { %482 = vmatpush.msrb.mxu3 %v454_v5 }
  0x63   :  { %441 = vmatmul.f32.gmra.mxu2 %v393_v38  ;;  %368 = vmatpush.msrb.mxu1 %v340_v16 }
  0x64   :  { %327 = vmatmul.f32.gmra.mxu0 %v279_v39  ;;  %483 = vmatpush.msrb.mxu3 %v453_v10 }
  0x65   :  { %369 = vmatpush.msrb.mxu1 %v339_v19 }
  0x66   :  { %484 = vmatpush.msrb.mxu3 %v452_v12 }
  0x67   :  { %370 = vmatpush.msrb.mxu1 %v338_v21 }
  0x68   :  { %485 = vmatpush.msrb.mxu3 %v451_v17 }
  0x69   :  { %371 = vmatpush.msrb.mxu1 %v337_v24 }
  0x6a   :  { %486 = vmatpush.msrb.mxu3 %v450_v20  ;;  %v526_v20 = vld [vmem:[%s744_s4 + $0x2] ss:$0 sm:$0xff] }
  0x6b   :  { %372 = vmatpush.msrb.mxu1 %v336_v28 }
  0xa9   :  { %v93_v7 = vpop.f32.mrf.mxu0 }
  0xaa   :  { %v94_v8 = vadd.f32 %v521_v1, %v93_v7  ;;  %v525_v7 = vld [vmem:[%s744_s4 + $0x1] ss:$0 sm:$0xff] }
  0xac   :  { %v105_v13 = vmax.f32 %v94_v8, 0.0 }
  0xae   :  { %v205_v14 = vpop.f32.mrf.mxu2  ;;  %145 = vmatmul.f32.vlgmr.msra.gmra.mxu1 %v105_v13 }
  0xaf   :  { %v206_v15 = vadd.f32 %v520_v6, %v205_v14 }
  0xb1   :  { %v217_v18 = vmax.f32 %v206_v15, 0.0  ;;  %v96_v22 = vpop.f32.mrf.mxu0 }
  0xb2   :  { %v97_v23 = vadd.f32 %v521_v1, %v96_v22 }
  0xb3   :  { %259 = vmatmul.f32.vlgmr.msra.gmra.mxu3 %v217_v18 }
  0xb4   :  { %v106_v25 = vmax.f32 %v97_v23, 0.0 }
  0xb6   :  { %v208_v26 = vpop.f32.mrf.mxu2  ;;  %148 = vmatmul.f32.gmra.mxu1 %v106_v25  ;;  %v527_v25 = vld [vmem:[%s744_s4 + $0x3] ss:$0 sm:$0xff] }
  0xb7   :  { %v209_v27 = vadd.f32 %v520_v6, %v208_v26 }
  0xb9   :  { %v218_v29 = vmax.f32 %v209_v27, 0.0  ;;  %v99_v30 = vpop.f32.mrf.mxu0 }
  0xba   :  { %v100_v31 = vadd.f32 %v521_v1, %v99_v30 }
  0xbb   :  { %262 = vmatmul.f32.gmra.mxu3 %v218_v29 }
  0xbc   :  { %v107_v32 = vmax.f32 %v100_v31, 0.0 }
  0xbe   :  { %v211_v33 = vpop.f32.mrf.mxu2  ;;  %151 = vmatmul.f32.gmra.mxu1 %v107_v32 }
  0xbf   :  { %v212_v34 = vadd.f32 %v520_v6, %v211_v33 }
  0xc1   :  { %v219_v35 = vmax.f32 %v212_v34, 0.0  ;;  %v102_v36 = vpop.f32.mrf.mxu0 }
  0xc2   :  { %v103_v37 = vadd.f32 %v521_v1, %v102_v36 }
  0xc3   :  { %265 = vmatmul.f32.gmra.mxu3 %v219_v35 }
  0xc4   :  { %v108_v38 = vmax.f32 %v103_v37, 0.0 }
  0xc6   :  { %v214_v39 = vpop.f32.mrf.mxu2  ;;  %154 = vmatmul.f32.gmra.mxu1 %v108_v38 }
  0xc7   :  { %v215_v40 = vadd.f32 %v520_v6, %v214_v39 }
  0xc9   :  { %v220_v42 = vmax.f32 %v215_v40, 0.0  ;;  %v319_v43 = vpop.f32.mrf.mxu0 }
  0xca   :  { %v320_v45 = vadd.f32 %v523_v41, %v319_v43 }
  0xcb   :  { %268 = vmatmul.f32.gmra.mxu3 %v220_v42 }
  0xcc   :  { %v331_v46 = vmax.f32 %v320_v45, 0.0 }
  0xce   :  { %v433_v47 = vpop.f32.mrf.mxu2  ;;  %373 = vmatmul.f32.vlgmr.msrb.gmra.mxu1 %v331_v46 }
  0xcf   :  { %v434_v48 = vadd.f32 %v522_v44, %v433_v47 }
  0xd1   :  { %v445_v49 = vmax.f32 %v434_v48, 0.0  ;;  %v322_v50 = vpop.f32.mrf.mxu0 }
  0xd2   :  { %v323_v51 = vadd.f32 %v523_v41, %v322_v50 }
  0xd3   :  { %487 = vmatmul.f32.vlgmr.msrb.gmra.mxu3 %v445_v49 }
  0xd4   :  { %v332_v52 = vmax.f32 %v323_v51, 0.0 }
  0xd6   :  { %v436_v53 = vpop.f32.mrf.mxu2  ;;  %376 = vmatmul.f32.gmra.mxu1 %v332_v52 }
  0xd7   :  { %v437_v54 = vadd.f32 %v522_v44, %v436_v53 }
  0xd9   :  { %v446_v55 = vmax.f32 %v437_v54, 0.0  ;;  %v325_v56 = vpop.f32.mrf.mxu0 }
  0xda   :  { %v326_v57 = vadd.f32 %v523_v41, %v325_v56 }
  0xdb   :  { %490 = vmatmul.f32.gmra.mxu3 %v446_v55 }
  0xdc   :  { %v333_v58 = vmax.f32 %v326_v57, 0.0 }
  0xde   :  { %v439_v59 = vpop.f32.mrf.mxu2  ;;  %379 = vmatmul.f32.gmra.mxu1 %v333_v58 }
  0xdf   :  { %v440_v60 = vadd.f32 %v522_v44, %v439_v59 }
  0xe1   :  { %v447_v61 = vmax.f32 %v440_v60, 0.0  ;;  %v328_v62 = vpop.f32.mrf.mxu0 }
  0xe2   :  { %v329_v63 = vadd.f32 %v523_v41, %v328_v62 }
  0xe3   :  { %493 = vmatmul.f32.gmra.mxu3 %v447_v61 }
  0xe4   :  { %v334_v0 = vmax.f32 %v329_v63, 0.0 }
  0xe6   :  { %v442_v1 = vpop.f32.mrf.mxu2  ;;  %382 = vmatmul.f32.gmra.mxu1 %v334_v0 }
  0xe7   :  { %v443_v2 = vadd.f32 %v522_v44, %v442_v1 }
  0xe9   :  { %v448_v3 = vmax.f32 %v443_v2, 0.0 }
  0xeb   :  { %496 = vmatmul.f32.gmra.mxu3 %v448_v3 }
 0x12b   :  { %v146_v5 = vpop.f32.mrf.mxu1 }
 0x12c   :  { %v147_v6 = vadd.f32 %v524_v4, %v146_v5 }
 0x12e   :  { %158 = vst [vmem:[%s745_s5] sm:$0xff] %v147_v6 }
 0x133   :  { %v149_v8 = vpop.f32.mrf.mxu1 }
 0x134   :  { %v150_v9 = vadd.f32 %v524_v4, %v149_v8 }
 0x136   :  { %v260_v10 = vpop.f32.mrf.mxu3  ;;  %159 = vst [vmem:[%s745_s5 + $0x20] sm:$0xff] %v150_v9 }
 0x137   :  { %v261_v11 = vadd.f32 %v525_v7, %v260_v10 }
 0x139   :  { %272 = vst [vmem:[%s745_s5 + $0x8] sm:$0xff] %v261_v11 }
 0x13b   :  { %v152_v12 = vpop.f32.mrf.mxu1 }
 0x13c   :  { %v153_v13 = vadd.f32 %v524_v4, %v152_v12 }
 0x13e   :  { %v263_v14 = vpop.f32.mrf.mxu3  ;;  %160 = vst [vmem:[%s745_s5 + $0x40] sm:$0xff] %v153_v13 }
 0x13f   :  { %v264_v15 = vadd.f32 %v525_v7, %v263_v14 }
 0x141   :  { %273 = vst [vmem:[%s745_s5 + $0x28] sm:$0xff] %v264_v15 }
 0x143   :  { %v155_v16 = vpop.f32.mrf.mxu1 }
 0x144   :  { %v156_v17 = vadd.f32 %v524_v4, %v155_v16 }
 0x146   :  { %v266_v18 = vpop.f32.mrf.mxu3  ;;  %161 = vst [vmem:[%s745_s5 + $0x60] sm:$0xff] %v156_v17 }
 0x147   :  { %v267_v19 = vadd.f32 %v525_v7, %v266_v18 }
 0x149   :  { %274 = vst [vmem:[%s745_s5 + $0x48] sm:$0xff] %v267_v19 }
 0x14b   :  { %v374_v21 = vpop.f32.mrf.mxu1 }
 0x14c   :  { %v375_v22 = vadd.f32 %v526_v20, %v374_v21 }
 0x14e   :  { %v269_v23 = vpop.f32.mrf.mxu3  ;;  %386 = vst [vmem:[%s745_s5 + $0x10] sm:$0xff] %v375_v22 }
 0x14f   :  { %v270_v24 = vadd.f32 %v525_v7, %v269_v23 }
 0x151   :  { %275 = vst [vmem:[%s745_s5 + $0x68] sm:$0xff] %v270_v24 }
 0x153   :  { %v377_v26 = vpop.f32.mrf.mxu1 }
 0x154   :  { %v378_v27 = vadd.f32 %v526_v20, %v377_v26 }
 0x156   :  { %v488_v28 = vpop.f32.mrf.mxu3  ;;  %387 = vst [vmem:[%s745_s5 + $0x30] sm:$0xff] %v378_v27 }
 0x157   :  { %v489_v29 = vadd.f32 %v527_v25, %v488_v28 }
 0x159   :  { %500 = vst [vmem:[%s745_s5 + $0x18] sm:$0xff] %v489_v29 }
 0x15b   :  { %v380_v30 = vpop.f32.mrf.mxu1 }
 0x15c   :  { %v381_v31 = vadd.f32 %v526_v20, %v380_v30 }
 0x15e   :  { %v491_v32 = vpop.f32.mrf.mxu3  ;;  %388 = vst [vmem:[%s745_s5 + $0x50] sm:$0xff] %v381_v31 }
 0x15f   :  { %v492_v33 = vadd.f32 %v527_v25, %v491_v32 }
 0x161   :  { %501 = vst [vmem:[%s745_s5 + $0x38] sm:$0xff] %v492_v33 }
 0x163   :  { %v383_v34 = vpop.f32.mrf.mxu1 }
 0x164   :  { %v384_v35 = vadd.f32 %v526_v20, %v383_v34 }
 0x166   :  { %v494_v36 = vpop.f32.mrf.mxu3  ;;  %389 = vst [vmem:[%s745_s5 + $0x70] sm:$0xff] %v384_v35 }
 0x167   :  { %v495_v37 = vadd.f32 %v527_v25, %v494_v36 }
 0x169   :  { %502 = vst [vmem:[%s745_s5 + $0x58] sm:$0xff] %v495_v37 }
 0x16e   :  { %v497_v38 = vpop.f32.mrf.mxu3 }
 0x16f   :  { %v498_v39 = vadd.f32 %v527_v25, %v497_v38 }
 0x171   :  { %503 = vst [vmem:[%s745_s5 + $0x78] sm:$0xff] %v498_v39 }
 0x172   :  { %508 = vsyncpa [#allocation3], 1 }
 0x173   :  { %509 = vsyncpa [#allocation5], 1 }

</bundles_post_ra>
